<compile_context>
chip_gen: v7x
topology: tpu7x:2x2x1
jax: 0.10.0
libtpu: 0.0.40
codegen_flags: <defaults>
</compile_context>

<pallas_src>
import jax
import jax.numpy as jnp
from jax.experimental import pallas as pl
from jax.experimental.pallas import tpu as pltpu


def mlp_kernel(x_ref, w1_ref, b1_ref, w2_ref, b2_ref, o_ref):
    # x_ref: [TILE_B, F]   w1_ref: [F, H]   b1_ref/w2_ref: [1, H]
    # b2_ref: SMEM scalar (1,)              o_ref: [TILE_B//128, 128]
    # fc1 on the MXU, f32 accumulation.
    h = jnp.dot(x_ref[...], w1_ref[...], preferred_element_type=jnp.float32)
    h = jnp.maximum(h + b1_ref[...], 0.0)                 # bias + ReLU (VPU)
    # fc2: N=1 matmul replaced by VPU multiply + lane reduction (XLU).
    y = jnp.sum(h * w2_ref[...], axis=-1) + b2_ref[0]     # [TILE_B]
    # Lane-dense store: [TILE_B] -> [TILE_B//128, 128].
    o_ref[...] = y.reshape(o_ref.shape).astype(o_ref.dtype)


def _round_up(n, m):
    return ((n + m - 1) // m) * m


def mlp_forward(x, w1, b1, w2_row, b2, *, tile_b=1024):
    """x: [B, F]; w1: [F, H]; b1: [1, H]; w2_row: [1, H]; b2: [1] -> [B, 1]."""
    B, F = x.shape
    H = w1.shape[1]

    # Pick a batch tile. Small batches: one grid step (pad to 128 rows).
    # Large batches: stream 1024-row tiles so the lane-dense output block is a
    # clean (8, 128) and per-step overhead is amortized.
    if B <= tile_b:
        b_pad = _round_up(max(B, 1), 128)
        tb = b_pad
    else:
        b_pad = _round_up(B, tile_b)
        tb = tile_b
    if b_pad != B:
        x = jnp.pad(x, ((0, b_pad - B), (0, 0)))
    num_tiles = b_pad // tb
    out_rows = tb // 128

    grid_spec = pltpu.PrefetchScalarGridSpec(
        num_scalar_prefetch=0,
        grid=(num_tiles,),
        in_specs=[
            # x: streamed batch tiles.
            pl.BlockSpec((tb, F), lambda i: (i, 0)),
            # Weights/biases: constant index_map -> resident across the grid.
            pl.BlockSpec((F, H), lambda i: (0, 0)),
            pl.BlockSpec((1, H), lambda i: (0, 0)),
            pl.BlockSpec((1, H), lambda i: (0, 0)),
            # b2 scalar in SMEM (no VMEM tile / DMA pair).
            pl.BlockSpec(memory_space=pltpu.MemorySpace.SMEM),
        ],
        # Lane-dense output: (tb//128, 128) per step.
        out_specs=pl.BlockSpec((out_rows, 128), lambda i: (i, 0)),
    )

    cost = pl.CostEstimate(
        flops=2 * b_pad * F * H + 2 * b_pad * H,
        transcendentals=0,
        bytes_accessed=(b_pad * F + F * H + 2 * H + 1 + b_pad) * 4,
    )

    out2d = pl.pallas_call(
        mlp_kernel,
        out_shape=jax.ShapeDtypeStruct((b_pad // 128, 128), jnp.float32),
        grid_spec=grid_spec,
        compiler_params=pltpu.CompilerParams(
            dimension_semantics=("parallel",)),
        cost_estimate=cost,
    )(x, w1, b1, w2_row, b2)

    # Un-pad and restore the [B, 1] shape expected by the module.
    return out2d.reshape(-1)[:B].reshape(B, 1)


if __name__ == "__main__":
    # Deterministic synthetic parameters (shapes from MLP.__init__):
    #   fc1: Linear(feature_size, hidden_size) -> weight [H, F], bias [H]
    #   fc2: Linear(hidden_size, 1)            -> weight [1, H], bias [1]
    batch, feature_size, hidden_size = 8, 32, 32

    key = jax.random.PRNGKey(0)
    kx, k1, kb1, k2, kb2 = jax.random.split(key, 5)

    x = jax.random.normal(kx, (batch, feature_size), dtype=jnp.float32)

    fc1_w = jax.random.normal(k1, (hidden_size, feature_size), jnp.float32) * 0.1
    fc1_b = jax.random.normal(kb1, (hidden_size,), jnp.float32) * 0.1
    fc2_w = jax.random.normal(k2, (1, hidden_size), jnp.float32) * 0.1
    fc2_b = jax.random.normal(kb2, (1,), jnp.float32) * 0.1

    # PyTorch stores weights as [out, in]; pre-arrange for the kernel.
    w1 = fc1_w.T                          # [F, H]
    b1 = fc1_b.reshape(1, hidden_size)    # [1, H]
    w2_row = fc2_w                        # [1, H] (row form for VPU reduction)
    b2 = fc2_b                            # [1]   (SMEM scalar)

    out = mlp_forward(x, w1, b1, w2_row, b2)
    jax.block_until_ready(out)

    ref = jnp.maximum(x @ w1 + b1, 0.0) @ fc2_w.T + fc2_b
    assert out.shape == (batch, 1)
    assert jnp.allclose(out, ref, atol=1e-5, rtol=1e-5)

    # Larger batch exercises the streaming grid path (2 tiles of 1024 rows,
    # weights resident, lane-dense (8,128) output blocks).
    xb = jax.random.normal(jax.random.PRNGKey(1), (2048, feature_size), jnp.float32)
    outb = mlp_forward(xb, w1, b1, w2_row, b2)
    jax.block_until_ready(outb)
    refb = jnp.maximum(xb @ w1 + b1, 0.0) @ fc2_w.T + fc2_b
    assert outb.shape == (2048, 1)
    assert jnp.allclose(outb, refb, atol=1e-4, rtol=1e-4)

    print("KERNEL_OK")
</pallas_src>

<mosaic_0001>
module attributes {stable_mosaic.version = 11 : i64} {
  func.func @mlp_kernel(%arg0: i32, %arg1: memref<128x32xf32, #tpu.memory_space<vmem>>, %arg2: memref<32x32xf32, #tpu.memory_space<vmem>>, %arg3: memref<1x32xf32, #tpu.memory_space<vmem>>, %arg4: memref<1x32xf32, #tpu.memory_space<vmem>>, %arg5: memref<1xf32, #tpu.memory_space<smem>>, %arg6: memref<1x128xf32, #tpu.memory_space<vmem>>) attributes {dimension_semantics = [#tpu.dimension_semantics<parallel>], iteration_bounds = array<i64: 1>, scalar_prefetch = 0 : i64, scratch_operands = 0 : i64, tpu.core_type = #tpu.core_type<tc>, window_params = [{transform_indices = @transform_0, window_bounds = array<i64: 128, 32>}, {pipeline_mode = #tpu.pipeline_mode<synchronous>, transform_indices = @transform_1, window_bounds = array<i64: 32, 32>}, {pipeline_mode = #tpu.pipeline_mode<synchronous>, transform_indices = @transform_2, window_bounds = array<i64: 1, 32>}, {pipeline_mode = #tpu.pipeline_mode<synchronous>, transform_indices = @transform_3, window_bounds = array<i64: 1, 32>}, {transform_indices = @transform_4, window_bounds = array<i64: 1>}, {transform_indices = @transform_5, window_bounds = array<i64: 1, 128>}]} {
    %c0 = arith.constant 0 : index
    %c0_0 = arith.constant 0 : index
    %0 = vector.load %arg1[%c0, %c0_0] : memref<128x32xf32, #tpu.memory_space<vmem>>, vector<128x32xf32>
    %c0_1 = arith.constant 0 : index
    %c0_2 = arith.constant 0 : index
    %1 = vector.load %arg2[%c0_1, %c0_2] : memref<32x32xf32, #tpu.memory_space<vmem>>, vector<32x32xf32>
    %cst = arith.constant dense<0.000000e+00> : vector<128x32xf32>
    %2 = tpu.matmul %0, %1, %cst {dimension_numbers = #tpu.dot_dimension_numbers<[1], [0], [0], [1], [0, 0, 1, 1], [], []>} : vector<128x32xf32>, vector<32x32xf32>, vector<128x32xf32> -> vector<128x32xf32>
    %c0_3 = arith.constant 0 : index
    %c0_4 = arith.constant 0 : index
    %3 = vector.load %arg3[%c0_3, %c0_4] : memref<1x32xf32, #tpu.memory_space<vmem>>, vector<1x32xf32>
    %4 = vector.broadcast %3 : vector<1x32xf32> to vector<128x32xf32>
    %5 = arith.addf %2, %4 : vector<128x32xf32>
    %cst_5 = arith.constant 0.000000e+00 : f32
    %6 = vector.broadcast %cst_5 : f32 to vector<128x32xf32>
    %7 = arith.maximumf %5, %6 : vector<128x32xf32>
    %c0_6 = arith.constant 0 : index
    %c0_7 = arith.constant 0 : index
    %8 = vector.load %arg4[%c0_6, %c0_7] : memref<1x32xf32, #tpu.memory_space<vmem>>, vector<1x32xf32>
    %9 = vector.broadcast %8 : vector<1x32xf32> to vector<128x32xf32>
    %10 = arith.mulf %7, %9 : vector<128x32xf32>
    %cst_8 = arith.constant dense<0.000000e+00> : vector<128xf32>
    %11 = vector.multi_reduction <add>, %10, %cst_8 [1] : vector<128x32xf32> to vector<128xf32>
    %c0_9 = arith.constant 0 : index
    %12 = memref.load %arg5[%c0_9] : memref<1xf32, #tpu.memory_space<smem>>
    %13 = vector.broadcast %12 : f32 to vector<128xf32>
    %14 = arith.addf %11, %13 : vector<128xf32>
    %15 = vector.shape_cast %14 : vector<128xf32> to vector<1x128xf32>
    %c0_10 = arith.constant 0 : index
    %c0_11 = arith.constant 0 : index
    %16 = vector.load %arg6[%c0_10, %c0_11] : memref<1x128xf32, #tpu.memory_space<vmem>>, vector<1x128xf32>
    tpu.vector_store %arg6[%c0_10, %c0_11], %15 {strides = array<i32>} : memref<1x128xf32, #tpu.memory_space<vmem>>, vector<1x128xf32>,
    return
  }
  func.func @transform_0(%arg0: i32) -> (i32, i32) {
    %c0_i32 = arith.constant 0 : i32
    %c0_i32_0 = arith.constant 0 : i32
    return %arg0, %c0_i32 : i32, i32
  }
  func.func @transform_1(%arg0: i32) -> (i32, i32) {
    %c0_i32 = arith.constant 0 : i32
    %c0_i32_0 = arith.constant 0 : i32
    %c0_i32_1 = arith.constant 0 : i32
    return %c0_i32, %c0_i32_0 : i32, i32
  }
  func.func @transform_2(%arg0: i32) -> (i32, i32) {
    %c0_i32 = arith.constant 0 : i32
    %c0_i32_0 = arith.constant 0 : i32
    %c0_i32_1 = arith.constant 0 : i32
    return %c0_i32, %c0_i32_0 : i32, i32
  }
  func.func @transform_3(%arg0: i32) -> (i32, i32) {
    %c0_i32 = arith.constant 0 : i32
    %c0_i32_0 = arith.constant 0 : i32
    %c0_i32_1 = arith.constant 0 : i32
    return %c0_i32, %c0_i32_0 : i32, i32
  }
  func.func @transform_4(%arg0: i32) -> i32 {
    %c0_i32 = arith.constant 0 : i32
    %c0_i32_0 = arith.constant 0 : i32
    return %c0_i32 : i32
  }
  func.func @transform_5(%arg0: i32) -> (i32, i32) {
    %c0_i32 = arith.constant 0 : i32
    %c0_i32_0 = arith.constant 0 : i32
    return %arg0, %c0_i32 : i32, i32
  }
}

</mosaic_0001>

<bundles_post_ra>
// kernel: tpu_custom_call.1
= control target key start
LH: loop header
LB: loop body
LE: loop exit
PB: predicated region body
PF: predicated region fallthrough
CT: control target
= control target key end

     0   :  { %vm49_vm0 = vcmask 261120   ;;  %s857_s0 = inlined_call_operand.vmem [shape: f32[128,32], index: 0, kind: input, shape index: {}]   ;;  %s858_s1 = inlined_call_operand.vmem [shape: f32[32,32], index: 1, kind: input, shape index: {}]   ;;  %s859_s2 = inlined_call_operand.vmem [shape: f32[1,32], index: 2, kind: input, shape index: {}]   ;;  %s860_s3 = inlined_call_operand.vmem [shape: f32[1,32], index: 3, kind: input, shape index: {}]   ;;  %s861_s4 = inlined_call_operand.<no memory space> [shape: f32[1], index: 4, kind: input, shape index: {}]   ;;  %s862_s5 = inlined_call_operand.hbm [shape: f32[1,128], index: 5, kind: output, shape index: {}]  }
   0x1   :  { %v38_v0 = vld [vmem:[%s858_s1] sm:$0xff]  ;;  %v39_v1 = vld [vmem:[%s858_s1 + $0x8] sm:$0xff]  ;;  %v40_v2 = vld [vmem:[%s858_s1 + $0x10] sm:$0xff] }
   0x2   :  { %v561_v3 = vpack.c.bf16 %v39_v1, %v38_v0  ;;  %v41_v4 = vld [vmem:[%s858_s1 + $0x18] sm:$0xff]  ;;  %v22_v5 = vld [vmem:[%s857_s0] sm:$0xff] }
   0x3   :  { %v30_v6 = vld [vmem:[%s857_s0 + $0x40] sm:$0xff]  ;;  %v565_v7 = vpack.c.bf16 %v41_v4, %v40_v2  ;;  %537 = vmatprep.mubr.msk.f32.mxu0 %vm49_vm0, %v22_v5 }
   0x4   :  { %549 = vmatprep.mubr.msk.f32.mxu1 %vm49_vm0, %v30_v6  ;;  %562 = vmatprep.subr.bf16.mxu0 %v561_v3 }
   0x5   :  { %569 = vmatprep.subr.bf16.mxu1 %v561_v3  ;;  %564 = vmatpush3.bf16.msra.mxu0 %v561_v3 }
   0x6   :  { %571 = vmatpush3.bf16.msra.mxu1 %v561_v3  ;;  %566 = vmatprep.subr.bf16.mxu0 %v565_v7 }
   0x7   :  { %570 = vmatprep.subr.bf16.mxu1 %v565_v7 }
   0x8   :  { %11 = vsyncpa [#allocation4], 0  ;;  %v23_v8 = vld [vmem:[%s857_s0 + $0x8] sm:$0xff]  ;;  %v24_v10 = vld [vmem:[%s857_s0 + $0x10] sm:$0xff]  ;;  %vm375_vm1 = vcmask 130112   ;;  %vm382_vm2 = vcmask 195712  }
   0x9   :  { %568 = vmatpush3.bf16.msra.mxu0 %v565_v7  ;;  %v31_v9 = vld [vmem:[%s857_s0 + $0x48] sm:$0xff]  ;;  %v32_v11 = vld [vmem:[%s857_s0 + $0x50] sm:$0xff]  ;;  %v25_v12 = vld [vmem:[%s857_s0 + $0x18] sm:$0xff]  ;;  %vm389_vm3 = vcmask 261312   ;;  %vm396_vm4 = vcmask 326912   ;;  %vm403_vm5 = vcmask 392512  }
   0xa   :  { %572 = vmatpush3.bf16.msra.mxu1 %v565_v7  ;;  %v33_v13 = vld [vmem:[%s857_s0 + $0x58] sm:$0xff]  ;;  %v26_v14 = vld [vmem:[%s857_s0 + $0x20] sm:$0xff]  ;;  %v27_v16 = vld [vmem:[%s857_s0 + $0x28] sm:$0xff]  ;;  %vm410_vm6 = vcmask 458112   ;;  %vm417_vm7 = vcmask 523712   ;;  %vm424_vm8 = vcmask 589312  }
   0xb   :  { %v34_v15 = vld [vmem:[%s857_s0 + $0x60] sm:$0xff]  ;;  %v35_v17 = vld [vmem:[%s857_s0 + $0x68] sm:$0xff]  ;;  %v28_v18 = vld [vmem:[%s857_s0 + $0x30] sm:$0xff]  ;;  %vm431_vm9 = vcmask 654912   ;;  %vm438_vm10 = vcmask 720512   ;;  %vm445_vm11 = vcmask 786112  }
   0xc   :  { %538 = vmatmul.mubr.msk.f32.vlgmr.msra.gmra.mrb[0].mxu0 %vm49_vm0, %v23_v8  ;;  %v36_v19 = vld [vmem:[%s857_s0 + $0x70] sm:$0xff]  ;;  %v29_v20 = vld [vmem:[%s857_s0 + $0x38] sm:$0xff]  ;;  %v708_v22 = vld [vmem:[%s859_s2] ss:$0 sm:$0xff]  ;;  %vm452_vm12 = vcmask 851712   ;;  %vm459_vm13 = vcmask 917312  }
   0xd   :  { %550 = vmatmul.mubr.msk.f32.vlgmr.msra.gmra.mrb[0].mxu1 %vm49_vm0, %v31_v9  ;;  %540 = vmatprep.mubr.msk.f32.mxu0 %vm49_vm0, %v24_v10  ;;  %v37_v21 = vld [vmem:[%s857_s0 + $0x78] sm:$0xff]  ;;  %v717_v31 = vld [vmem:[%s860_s3] ss:$0 sm:$0xff]  ;;  %vm466_vm14 = vcmask 982912   ;;  %vm473_vm15 = vcmask 1048512  }
   0xe   :  { %552 = vmatprep.mubr.msk.f32.mxu1 %vm49_vm0, %v32_v11 }
  0x10   :  { %541 = vmatmul.mubr.msk.f32.gmra.mrb[2].mxu0 %vm49_vm0, %v25_v12 }
  0x11   :  { %553 = vmatmul.mubr.msk.f32.gmra.mrb[2].mxu1 %vm49_vm0, %v33_v13  ;;  %543 = vmatprep.mubr.msk.f32.mxu0 %vm49_vm0, %v26_v14 }
  0x12   :  { %555 = vmatprep.mubr.msk.f32.mxu1 %vm49_vm0, %v34_v15 }
  0x14   :  { %544 = vmatmul.mubr.msk.f32.gmra.mrb[4].mxu0 %vm49_vm0, %v27_v16 }
  0x15   :  { %556 = vmatmul.mubr.msk.f32.gmra.mrb[4].mxu1 %vm49_vm0, %v35_v17  ;;  %546 = vmatprep.mubr.msk.f32.mxu0 %vm49_vm0, %v28_v18 }
  0x16   :  { %558 = vmatprep.mubr.msk.f32.mxu1 %vm49_vm0, %v36_v19 }
  0x18   :  { %547 = vmatmul.mubr.msk.f32.gmra.mrb[6].mxu0 %vm49_vm0, %v29_v20 }
  0x19   :  { %559 = vmatmul.mubr.msk.f32.gmra.mrb[6].mxu1 %vm49_vm0, %v37_v21 }
  0xdf   :  { %v539_v23 = vpop.f32.mrb[0].mxu0 }
  0xe0   :  { %v551_v24 = vpop.f32.mrb[0].mxu1  ;;  %v170_v25 = vadd.f32 %v539_v23, %v708_v22  ;;  %v164_v27 = vpop.f32.mrb[1].mxu0 }
  0xe1   :  { %v210_v26 = vadd.f32 %v551_v24, %v708_v22  ;;  %v204_v28 = vpop.f32.mrb[1].mxu1  ;;  %v165_v29 = vadd.f32 %v708_v22, %v164_v27 }
  0xe2   :  { %v205_v30 = vadd.f32 %v708_v22, %v204_v28  ;;  %v244_v32 = vmax.f32 %v170_v25, 0.0 }
  0xe3   :  { %v252_v33 = vmax.f32 %v210_v26, 0.0  ;;  %v243_v34 = vmax.f32 %v165_v29, 0.0  ;;  %v542_v35 = vpop.f32.mrb[2].mxu0 }
  0xe4   :  { %v554_v36 = vpop.f32.mrb[2].mxu1  ;;  %v180_v37 = vadd.f32 %v542_v35, %v708_v22  ;;  %v174_v38 = vpop.f32.mrb[3].mxu0  ;;  %v267_v41 = vmul.f32 %v717_v31, %v244_v32  ;;  %v251_v43 = vmax.f32 %v205_v30, 0.0 }
  0xe5   :  { %v275_v39 = vmul.f32 %v717_v31, %v252_v33  ;;  %v220_v40 = vadd.f32 %v554_v36, %v708_v22  ;;  %v214_v42 = vpop.f32.mrb[3].mxu1  ;;  %v175_v44 = vadd.f32 %v708_v22, %v174_v38  ;;  %v266_v46 = vmul.f32 %v717_v31, %v243_v34 }
  0xe6   :  { %v215_v45 = vadd.f32 %v708_v22, %v214_v42  ;;  %v246_v47 = vmax.f32 %v180_v37, 0.0  ;;  %v285_v50 = vsel %vm49_vm0, %v267_v41, 0.0  ;;  %v274_v59 = vmul.f32 %v717_v31, %v251_v43 }
  0xe7   :  { %v309_v48 = vsel %vm49_vm0, %v275_v39, 0.0  ;;  %v254_v49 = vmax.f32 %v220_v40, 0.0  ;;  %286 = vadd.xlane.f32.xlu0 %v285_v50  ;;  %v545_v51 = vpop.f32.mrb[4].mxu0  ;;  %v245_v60 = vmax.f32 %v175_v44, 0.0  ;;  %v282_v63 = vsel %vm49_vm0, %v266_v46, 0.0 }
  0xe8   :  { %310 = vadd.xlane.f32.xlu1 %v309_v48  ;;  %v557_v52 = vpop.f32.mrb[4].mxu1  ;;  %v269_v53 = vmul.f32 %v717_v31, %v246_v47  ;;  %v190_v54 = vadd.f32 %v545_v51, %v708_v22  ;;  %v184_v55 = vpop.f32.mrb[5].mxu0  ;;  %v253_v61 = vmax.f32 %v215_v45, 0.0  ;;  %v306_v9 = vsel %vm49_vm0, %v274_v59, 0.0 }
  0xe9   :  { %v277_v56 = vmul.f32 %v717_v31, %v254_v49  ;;  %v224_v57 = vpop.f32.mrb[5].mxu1  ;;  %v185_v58 = vadd.f32 %v708_v22, %v184_v55  ;;  %v268_v10 = vmul.f32 %v717_v31, %v245_v60  ;;  %v230_v12 = vadd.f32 %v557_v52, %v708_v22 }
  0xea   :  { %v291_v62 = vsel %vm49_vm0, %v269_v53, 0.0  ;;  %v248_v2 = vmax.f32 %v190_v54, 0.0  ;;  %v276_v11 = vmul.f32 %v717_v31, %v253_v61  ;;  %v225_v13 = vadd.f32 %v708_v22, %v224_v57 }
  0xeb   :  { %283 = vadd.xlane.f32.xlu0 %v282_v63  ;;  %v548_v0 = vpop.f32.mrb[6].mxu0  ;;  %v247_v3 = vmax.f32 %v185_v58, 0.0  ;;  %v315_v4 = vsel %vm49_vm0, %v277_v56, 0.0  ;;  %v288_v18 = vsel %vm49_vm0, %v268_v10, 0.0  ;;  %v256_v20 = vmax.f32 %v230_v12, 0.0 }
  0xec   :  { %292 = vadd.xlane.f32.xlu1 %v291_v62  ;;  %v560_v1 = vpop.f32.mrb[6].mxu1  ;;  %v200_v5 = vadd.f32 %v548_v0, %v708_v22  ;;  %v194_v6 = vpop.f32.mrb[7].mxu0  ;;  %v271_v16 = vmul.f32 %v717_v31, %v248_v2  ;;  %v312_v19 = vsel %vm49_vm0, %v276_v11, 0.0  ;;  %v255_v21 = vmax.f32 %v225_v13, 0.0 }
  0xed   :  { %v234_v7 = vpop.f32.mrb[7].mxu1  ;;  %v195_v8 = vadd.f32 %v708_v22, %v194_v6  ;;  %v270_v17 = vmul.f32 %v717_v31, %v247_v3  ;;  %v240_v23 = vadd.f32 %v560_v1, %v708_v22  ;;  %v279_v29 = vmul.f32 %v717_v31, %v256_v20 }
  0xee   :  { %v250_v14 = vmax.f32 %v200_v5, 0.0  ;;  %v235_v24 = vadd.f32 %v708_v22, %v234_v7  ;;  %v297_v25 = vsel %vm49_vm0, %v271_v16, 0.0  ;;  %v278_v30 = vmul.f32 %v717_v31, %v255_v21 }
  0xef   :  { %307 = vadd.xlane.f32.xlu0 %v306_v9  ;;  %v249_v15 = vmax.f32 %v195_v8, 0.0  ;;  %v294_v26 = vsel %vm49_vm0, %v270_v17, 0.0  ;;  %v258_v32 = vmax.f32 %v240_v23, 0.0  ;;  %v321_v35 = vsel %vm49_vm0, %v279_v29, 0.0 }
  0xf0   :  { %316 = vadd.xlane.f32.xlu1 %v315_v4  ;;  %v273_v27 = vmul.f32 %v717_v31, %v250_v14  ;;  %v257_v33 = vmax.f32 %v235_v24, 0.0  ;;  %v318_v36 = vsel %vm49_vm0, %v278_v30, 0.0  ;;  %v364_v41 = vlaneseq }
  0xf1   :  { %v272_v28 = vmul.f32 %v717_v31, %v249_v15  ;;  %v281_v37 = vmul.f32 %v717_v31, %v258_v32  ;;  %v773_v48 = vstv %s861_s4  ;;  %s598_s4 = smov [#allocation3]  }
  0xf2   :  { %v303_v34 = vsel %vm49_vm0, %v273_v27, 0.0  ;;  %v280_v38 = vmul.f32 %v717_v31, %v257_v33  ;;  %v765_v44 = vand.u32 127, %v364_v41  ;;  %v767_v47 = vshrl.u32 %v364_v41, 7  ;;  %s483_s9 = sshll.u32 %s598_s4, 4  ;;  %s484_s9 = int_to_ptr.vmem [resolvable:$true] %s483_s9 }
  0xf3   :  { %313 = vadd.xlane.f32.xlu0 %v312_v19  ;;  %v300_v22 = vsel %vm49_vm0, %v272_v28, 0.0  ;;  %v327_v39 = vsel %vm49_vm0, %v281_v37, 0.0  ;;  %s574_s10 = scalar_lea.vmem %s484_s9, 16  ;;  %s578_s11 = scalar_lea.vmem %s484_s9, 32 }
  0xf4   :  { %289 = vadd.xlane.f32.xlu1 %v288_v18  ;;  %v324_v40 = vsel %vm49_vm0, %v280_v38, 0.0  ;;  %v370_v31 = vadd.s32 4294967288, %v765_v44  ;;  %v377_v49 = vadd.s32 4294967280, %v765_v44  ;;  %v368_v50 = vsub.s32 %v765_v44, %v767_v47  ;;  %p575_p0 = scmp.ne.s32.totalorder %s484_s9, %s574_s10  ;;  %p579_p1 = scmp.lt.s32.totalorder %s484_s9, %s484_s9 }
  0xf5   :  { %v782_v54 = vadd.s32 4294967224, %v765_v44  ;;  %v384_v55 = vadd.s32 4294967272, %v765_v44  ;;  %v788_v58 = vadd.s32 4294967232, %v765_v44  ;;  %v391_v60 = vadd.s32 4294967264, %v765_v44  ;;  %p580_p2 = scmp.lt.s32.totalorder %s578_s11, %s574_s10 }
  0xf6   :  { %v373_v56 = vsub.s32 %v370_v31, %v767_v47  ;;  %v380_v59 = vsub.s32 %v377_v49, %v767_v47  ;;  %v793_v62 = vadd.s32 4294967208, %v765_v44  ;;  %v796_v0 = vadd.s32 4294967216, %v765_v44 }
  0xf7   :  { %295 = vadd.xlane.f32.xlu0 %v294_v26  ;;  %v398_v2 = vadd.s32 4294967256, %v765_v44  ;;  %v429_v3 = vsub.s32 %v782_v54, %v767_v47  ;;  %v387_v4 = vsub.s32 %v384_v55, %v767_v47  ;;  %v412_v8 = vadd.s32 4294967240, %v765_v44  ;;  %p581_p3 = por %p580_p2, %p579_p1 }
  0xf8   :  { %298 = vadd.xlane.f32.xlu1 %v297_v25  ;;  %v422_v9 = vsub.s32 %v788_v58, %v767_v47  ;;  %v394_v11 = vsub.s32 %v391_v60, %v767_v47  ;;  %v405_v12 = vadd.s32 4294967248, %v765_v44  ;;  %v443_v14 = vsub.s32 %v793_v62, %v767_v47 }
  0xf9   :  { %v436_v15 = vsub.s32 %v796_v0, %v767_v47  ;;  %v401_v16 = vsub.s32 %v398_v2, %v767_v47  ;;  %v415_v24 = vsub.s32 %v412_v8, %v767_v47  ;;  %v454_v25 = vadd.s32 4294967192, %v765_v44  ;;  %p582_p4 = pnand %p581_p3, %p575_p0 }
  0xfa   :  { %v408_v27 = vsub.s32 %v405_v12, %v767_v47  ;;  %v447_v33 = vadd.s32 4294967200, %v765_v44 }
  0xfb   :  { %301 = vadd.xlane.f32.xlu0 %v300_v22  ;;  %v457_v38 = vsub.s32 %v454_v25, %v767_v47 }
  0xfc   :  { %304 = vadd.xlane.f32.xlu1 %v303_v34 }
  0xff   :  { %319 = vadd.xlane.f32.xlu0 %v318_v36 }
 0x100   :  { %322 = vadd.xlane.f32.xlu1 %v321_v35 }
 0x103   :  { %325 = vadd.xlane.f32.xlu0 %v324_v40 }
 0x104   :  { %328 = vadd.xlane.f32.xlu1 %v327_v39  ;;  %v468_v39 = vadd.s32 4294967176, %v765_v44 }
 0x106   :  { %v471_v58 = vsub.s32 %v468_v39, %v767_v47 }
 0x174   :  { %v287_v43 = vpop.xlane.xlu0 %286 }
 0x175   :  { %v763_v42 = vpop.xlane.xlu1 %310  ;;  %v333_v57 = vadd.f32 %v773_v48, %v287_v43 }
 0x176   :  { %v341_v37 = vadd.f32 %v773_v48, %v763_v42  ;;  %v450_v42 = vsub.s32 %v447_v33, %v767_v47 }
 0x177   :  { %v374_v6 = vrot.slane %v333_v57, %v373_v56 }
 0x178   :  { %v284_v46 = vpop.xlane.xlu0 %283  ;;  %v430_v55 = vrot.slane %v341_v37, %v429_v3 }
 0x179   :  { %v293_v45 = vpop.xlane.xlu1 %292  ;;  %v332_v51 = vadd.f32 %v773_v48, %v284_v46 }
 0x17a   :  { %v335_v7 = vadd.f32 %v773_v48, %v293_v45  ;;  %v461_v45 = vadd.s32 4294967184, %v765_v44 }
 0x17b   :  { %v369_v61 = vrot.slane %v332_v51, %v368_v50 }
 0x17c   :  { %v308_v53 = vpop.xlane.xlu0 %307  ;;  %v388_v23 = vrot.slane %v335_v7, %v387_v4 }
 0x17d   :  { %v779_v52 = vpop.xlane.xlu1 %316  ;;  %v376_v13 = vsel %vm375_vm1, %v374_v6, %v369_v61  ;;  %v340_v34 = vadd.f32 %v773_v48, %v308_v53 }
 0x17e   :  { %v343_v46 = vadd.f32 %v773_v48, %v779_v52 }
 0x17f   :  { %v423_v51 = vrot.slane %v340_v34, %v422_v9 }
 0x180   :  { %v314_v1 = vpop.xlane.xlu0 %313  ;;  %v444_v60 = vrot.slane %v343_v46, %v443_v14 }
 0x181   :  { %v290_v63 = vpop.xlane.xlu1 %289  ;;  %v342_v40 = vadd.f32 %v773_v48, %v314_v1 }
 0x182   :  { %v334_v5 = vadd.f32 %v773_v48, %v290_v63 }
 0x183   :  { %v437_v52 = vrot.slane %v342_v40, %v436_v15 }
 0x184   :  { %v381_v10 = vrot.slane %v334_v5, %v380_v59  ;;  %v296_v18 = vpop.xlane.xlu0 %295  ;;  %v464_v59 = vsub.s32 %v461_v45, %v767_v47 }
 0x185   :  { %v299_v17 = vpop.xlane.xlu1 %298  ;;  %v336_v21 = vadd.f32 %v773_v48, %v296_v18 }
 0x186   :  { %v383_v19 = vsel %vm382_vm2, %v381_v10, %v376_v13  ;;  %v337_v20 = vadd.f32 %v773_v48, %v299_v17 }
 0x187   :  { %v395_v26 = vrot.slane %v336_v21, %v394_v11  ;;  %v390_v29 = vsel %vm389_vm3, %v388_v23, %v383_v19 }
 0x188   :  { %v402_v28 = vrot.slane %v337_v20, %v401_v16  ;;  %v302_v32 = vpop.xlane.xlu0 %301 }
 0x189   :  { %v305_v30 = vpop.xlane.xlu1 %304  ;;  %v397_v22 = vsel %vm396_vm4, %v395_v26, %v390_v29  ;;  %v338_v36 = vadd.f32 %v773_v48, %v302_v32 }
 0x18a   :  { %v339_v35 = vadd.f32 %v773_v48, %v305_v30  ;;  %v404_v31 = vsel %vm403_vm5, %v402_v28, %v397_v22 }
 0x18b   :  { %v409_v43 = vrot.slane %v338_v36, %v408_v27 }
 0x18c   :  { %v416_v41 = vrot.slane %v339_v35, %v415_v24  ;;  %v320_v50 = vpop.xlane.xlu0 %319 }
 0x18d   :  { %v323_v49 = vpop.xlane.xlu1 %322  ;;  %v411_v53 = vsel %vm410_vm6, %v409_v43, %v404_v31  ;;  %v344_v54 = vadd.f32 %v773_v48, %v320_v50 }
 0x18e   :  { %v418_v56 = vsel %vm417_vm7, %v416_v41, %v411_v53  ;;  %v345_v44 = vadd.f32 %v773_v48, %v323_v49 }
 0x18f   :  { %v425_v57 = vsel %vm424_vm8, %v423_v51, %v418_v56  ;;  %v451_v1 = vrot.slane %v344_v54, %v450_v42 }
 0x190   :  { %v432_v61 = vsel %vm431_vm9, %v430_v55, %v425_v57  ;;  %v326_v63 = vpop.xlane.xlu0 %325  ;;  %v458_v4 = vrot.slane %v345_v44, %v457_v38 }
 0x191   :  { %v329_v62 = vpop.xlane.xlu1 %328  ;;  %v439_v0 = vsel %vm438_vm10, %v437_v52, %v432_v61  ;;  %v346_v3 = vadd.f32 %v773_v48, %v326_v63 }
 0x192   :  { %v347_v2 = vadd.f32 %v773_v48, %v329_v62  ;;  %v446_v5 = vsel %vm445_vm11, %v444_v60, %v439_v0 }
 0x193   :  { %v453_v47 = vsel %vm452_vm12, %v451_v1, %v446_v5  ;;  %v465_v7 = vrot.slane %v346_v3, %v464_v59 }
 0x194   :  { %v472_v6 = vrot.slane %v347_v2, %v471_v58  ;;  %v460_v8 = vsel %vm459_vm13, %v458_v4, %v453_v47 }
 0x195   :  { %v467_v9 = vsel %vm466_vm14, %v465_v7, %v460_v8 }
 0x196   :  { %v474_v10 = vsel %vm473_vm15, %v472_v6, %v467_v9 }
 0x197   :  { %476 = vst [vmem:[#allocation3] sm:$0x1] %v474_v10 }
 0x198   :  { %585 = shalt.err (!%p582_p4)
}
 0x199   :  { %s586_s14 = scalar_lea.hbm %s862_s5, 16 }
 0x19a   :  { %p587_p5 = scmp.ne.s32.totalorder %s862_s5, %s586_s14  ;;  %p590_p6 = scmp.lt.u32.totalorder %s586_s14, %s862_s5 }
 0x19c   :  { %p592_p7 = pnand %p590_p6, %p587_p5 }
 0x19e   :  { %595 = shalt.err (!%p592_p7)
}
 0x19f   :  { %486 = dma.vmem_to_hbm [thread:$0]  %s484_s9, 16, %s862_s5, [#allocation4]  }
 0x1a0   :  { %596 = dma.done.wait [#allocation4], 16  }
 0x1a1   :  { %597 = vsyncadd [#allocation4], 4294967280 }
 0x1a2   :  { %490 = vsyncpa [#allocation4], 1 }

</bundles_post_ra>
